<compile_context>
chip_gen: v7x
topology: tpu7x:2x2x1
jax: 0.10.0
libtpu: 0.0.40
codegen_flags: <defaults>
</compile_context>

<pallas_src>
import jax
import jax.numpy as jnp
from jax.experimental import pallas as pl
from jax.experimental.pallas import tpu as pltpu


LANES = 128  # TPU vreg lane width; the output is laid out lane-dense.


def _single_variance_kernel(var_ref, out_ref):
    """Fill one output tile with exp(variance * 10).

    var_ref : SMEM f32[1]              -- the learned scalar parameter
    out_ref : VMEM f32[TILE_R, 128]    -- lane-dense tile of the flat output
    """
    s = var_ref[0] * 10.0
    # One EUP pass on a single (1, 128) vreg, then a cheap sublane broadcast
    # to the full tile -> a single unmasked lane-dense store per grid step.
    row = jnp.exp(jnp.full((1, LANES), s, dtype=jnp.float32))
    out_ref[...] = jnp.broadcast_to(row, out_ref.shape)


def single_variance_forward(x, variance, *, tile_rows=1024):
    """Pallas equivalent of SingleVarianceNetwork.forward.

    Returns float32 [len(x), 1] filled with exp(variance * 10.0).
    Only len(x) is used (exactly as in the PyTorch module), so x itself is
    never read / DMA'd by the kernel.
    """
    n = int(x.shape[0])
    var_arr = jnp.asarray(variance, jnp.float32).reshape((1,))

    # Lay the N output scalars out as rows of 128 lanes, padded so the grid
    # divides evenly.  tile_rows is kept a multiple of 8 (sublane granule)
    # and clamped to the problem size so tiny batches don't over-pad.
    rows = pl.cdiv(n, LANES)
    tile_rows = max(8, min(tile_rows, pl.cdiv(rows, 8) * 8))
    rows_pad = pl.cdiv(rows, tile_rows) * tile_rows
    grid = (rows_pad // tile_rows,)

    out_flat = pl.pallas_call(
        _single_variance_kernel,
        out_shape=jax.ShapeDtypeStruct((rows_pad, LANES), jnp.float32),
        grid=grid,
        in_specs=[
            # Scalar parameter in SMEM, constant across all grid steps.
            pl.BlockSpec(memory_space=pltpu.MemorySpace.SMEM),
        ],
        out_specs=pl.BlockSpec((tile_rows, LANES), lambda i: (i, 0)),
        compiler_params=pltpu.CompilerParams(
            # The N-tile axis is embarrassingly parallel -> both TCs on v7x.
            dimension_semantics=("parallel",),
        ),
    )(var_arr)

    # Free layout plumbing back to the module's [N, 1] output shape.
    return out_flat.reshape(-1)[:n].reshape(n, 1)


if __name__ == "__main__":
    key = jax.random.PRNGKey(0)

    init_val = 0.3  # SingleVarianceNetwork(init_val) -> the `variance` parameter
    variance = jnp.float32(init_val)

    # Small, module-consistent shapes: a batch of N query points (N x 3).
    # Note: the forward only uses len(x); the coordinates are irrelevant.
    n = 1000
    x = jax.random.uniform(key, (n, 3), jnp.float32)

    out = single_variance_forward(x, variance)
    out = jax.block_until_ready(out)

    ref = jnp.ones((n, 1), jnp.float32) * jnp.exp(variance * 10.0)
    assert out.shape == (n, 1)
    assert jnp.allclose(out, ref, rtol=1e-5, atol=1e-5)

    # A second, larger batch exercises a multi-step "parallel" grid.
    n2 = 200_000
    x2 = jax.random.uniform(key, (n2, 3), jnp.float32)
    out2 = jax.block_until_ready(single_variance_forward(x2, variance))
    ref2 = jnp.ones((n2, 1), jnp.float32) * jnp.exp(variance * 10.0)
    assert out2.shape == (n2, 1)
    assert jnp.allclose(out2, ref2, rtol=1e-5, atol=1e-5)

    print("KERNEL_OK")
</pallas_src>

<mosaic_0001>
module attributes {stable_mosaic.version = 11 : i64} {
  func.func @_single_variance_kernel(%arg0: i32, %arg1: memref<1xf32, #tpu.memory_space<smem>>, %arg2: memref<8x128xf32, #tpu.memory_space<vmem>>) attributes {dimension_semantics = [#tpu.dimension_semantics<parallel>], iteration_bounds = array<i64: 1>, scalar_prefetch = 0 : i64, scratch_operands = 0 : i64, tpu.core_type = #tpu.core_type<tc>, window_params = [{transform_indices = @transform_0, window_bounds = array<i64: 1>}, {transform_indices = @transform_1, window_bounds = array<i64: 8, 128>}]} {
    %c0 = arith.constant 0 : index
    %0 = memref.load %arg1[%c0] : memref<1xf32, #tpu.memory_space<smem>>
    %cst = arith.constant 1.000000e+01 : f32
    %1 = arith.mulf %0, %cst : f32
    %2 = vector.broadcast %1 : f32 to vector<1x128xf32>
    %3 = math.exp %2 : vector<1x128xf32>
    %4 = vector.shape_cast %3 : vector<1x128xf32> to vector<1x128xf32>
    %5 = vector.broadcast %4 : vector<1x128xf32> to vector<8x128xf32>
    %c0_0 = arith.constant 0 : index
    %c0_1 = arith.constant 0 : index
    %6 = vector.load %arg2[%c0_0, %c0_1] : memref<8x128xf32, #tpu.memory_space<vmem>>, vector<8x128xf32>
    tpu.vector_store %arg2[%c0_0, %c0_1], %5 {strides = array<i32>} : memref<8x128xf32, #tpu.memory_space<vmem>>, vector<8x128xf32>,
    return
  }
  func.func @transform_0(%arg0: i32) -> i32 {
    %c0_i32 = arith.constant 0 : i32
    %c0_i32_0 = arith.constant 0 : i32
    return %c0_i32 : i32
  }
  func.func @transform_1(%arg0: i32) -> (i32, i32) {
    %c0_i32 = arith.constant 0 : i32
    %c0_i32_0 = arith.constant 0 : i32
    return %arg0, %c0_i32 : i32, i32
  }
}

</mosaic_0001>

<bundles_post_ra>
// kernel: tpu_custom_call.1
= control target key start
LH: loop header
LB: loop body
LE: loop exit
PB: predicated region body
PF: predicated region fallthrough
CT: control target
= control target key end

     0   :  { %s83_s0 = inlined_call_operand.<no memory space> [shape: f32[1], index: 0, kind: input, shape index: {}]   ;;  %s84_s1 = inlined_call_operand.hbm [shape: f32[8,128], index: 1, kind: output, shape index: {}]  }
   0x1   :  { %s11_s8 = smul.f32 10.0, %s83_s0 }
   0x2   :  { %7 = vsyncpa [#allocation4], 0  ;;  %s57_s9 = smov [#allocation3]  }
   0x3   :  { %v12_v0 = vstv %s11_s8  ;;  %s22_s10 = sshll.u32 %s57_s9, 4  ;;  %s23_s10 = int_to_ptr.vmem [resolvable:$true] %s22_s10 }
   0x4   :  { %v13_v1 = vmul.f32 1.442695, %v12_v0  ;;  %s33_s11 = scalar_lea.vmem %s23_s10, 128  ;;  %p38_p1 = scmp.lt.s32.totalorder %s23_s10, %s23_s10 }
   0x5   :  { %p34_p0 = scmp.ne.s32.totalorder %s23_s10, %s33_s11  ;;  %p39_p2 = scmp.lt.s32.totalorder %s33_s11, %s33_s11 }
   0x6   :  { %31 = vpow2.f32 %v13_v1 }
   0x7   :  { %p40_p3 = por %p39_p2, %p38_p1 }
   0x9   :  { %p41_p4 = pnand %p40_p3, %p34_p0 }
  0x10   :  { %v32_v2 = vpop.eup %31 }
  0x11   :  { %15 = vst [vmem:[#allocation3] sm:$0xff] %v32_v2 }
  0x12   :  { %44 = shalt.err (!%p41_p4)
}
  0x13   :  { %s45_s0 = scalar_lea.hbm %s84_s1, 128 }
  0x14   :  { %p46_p5 = scmp.ne.s32.totalorder %s84_s1, %s45_s0  ;;  %p49_p6 = scmp.lt.u32.totalorder %s45_s0, %s84_s1 }
  0x16   :  { %p51_p7 = pnand %p49_p6, %p46_p5 }
  0x18   :  { %54 = shalt.err (!%p51_p7)
}
  0x19   :  { %25 = dma.vmem_to_hbm [thread:$0]  %s23_s10, 128, %s84_s1, [#allocation4]  }
  0x1a   :  { %55 = dma.done.wait [#allocation4], 128  }
  0x1b   :  { %56 = vsyncadd [#allocation4], 4294967168 }
  0x1c   :  { %29 = vsyncpa [#allocation4], 1 }

</bundles_post_ra>
